<compile_context>
chip_gen: v6e
topology: v6e:2x2x1
jax: 0.10.0
libtpu: 0.0.40
codegen_flags: <defaults>
</compile_context>

<pallas_src>
import functools
import math

import jax
import jax.numpy as jnp
from jax.experimental import pallas as pl
from jax.experimental.pallas import tpu as pltpu

# ----------------------------- configuration --------------------------------
B = 2          # batch
L = 8          # sequence length
H = 32         # d_model
NH = 4         # n_heads
DK = 8         # d_k
DV = 8         # d_v   (NH * DK == NH * DV == H)
EPS = 1e-5
NEG_INF = -1000000000.0


# ------------------------------- kernel -------------------------------------
def _mha_fused_kernel(xq_ref, xk_ref, xv_ref, mask_ref,
                      wq_ref, wk_ref, wv_ref, wo_ref,
                      out_ref, attn_ref, *, scale):
    """One batch element per grid step: full MHA forward fused in VMEM."""
    xq = xq_ref[0]            # [L, H]  (also the residual)
    xk = xk_ref[0]            # [L, H]
    xv = xv_ref[0]            # [L, H]
    mask = mask_ref[0]        # [L, L] float, 1.0 where masked
    wo = wo_ref[...]          # [NH*DV, H]

    # QKV projections (bias-free Linear layers).
    q = jnp.dot(xq, wq_ref[...], preferred_element_type=jnp.float32)  # [L, NH*DK]
    k = jnp.dot(xk, wk_ref[...], preferred_element_type=jnp.float32)  # [L, NH*DK]
    v = jnp.dot(xv, wv_ref[...], preferred_element_type=jnp.float32)  # [L, NH*DV]

    # Accumulate the output projection per head on top of the residual:
    #   context @ Wo = sum_h context_h @ Wo[h*DV:(h+1)*DV, :]
    out_acc = xq
    for h in range(NH):                                  # static unroll, NH=4
        qh = q[:, h * DK:(h + 1) * DK]                   # [L, DK]
        kh = k[:, h * DK:(h + 1) * DK]                   # [L, DK]
        vh = v[:, h * DV:(h + 1) * DV]                   # [L, DV]

        s = jnp.dot(qh, kh.T, preferred_element_type=jnp.float32) * scale
        s = jnp.where(mask > 0.0, NEG_INF, s)            # masked_fill(-1e9)
        mx = jnp.max(s, axis=-1, keepdims=True)
        p = jnp.exp(s - mx)
        attn = p / jnp.sum(p, axis=-1, keepdims=True)    # softmax(dim=-1)
        attn_ref[0, h] = attn                            # [L, L]

        ctx_h = jnp.dot(attn, vh, preferred_element_type=jnp.float32)   # [L, DV]
        out_acc = out_acc + jnp.dot(ctx_h, wo[h * DV:(h + 1) * DV, :],
                                    preferred_element_type=jnp.float32)

    # LayerNorm(d_model) with fresh (gamma=1, beta=0) affine, eps=1e-5.
    mu = jnp.mean(out_acc, axis=-1, keepdims=True)
    var = jnp.mean((out_acc - mu) ** 2, axis=-1, keepdims=True)
    out_ref[0] = (out_acc - mu) * jax.lax.rsqrt(var + EPS)


# ------------------------------ wrapper --------------------------------------
@jax.jit
def multi_head_attention(input_Q, input_K, input_V, attn_mask, wq, wk, wv, wo):
    """Fused Pallas MHA.  Returns (LayerNorm(fc(context)+residual), attn)."""
    Bn, Ln, Hn = input_Q.shape
    scale = 1.0 / math.sqrt(DK)
    mask_f = attn_mask.astype(jnp.float32)               # 1.0 where masked

    out, attn = pl.pallas_call(
        functools.partial(_mha_fused_kernel, scale=scale),
        out_shape=(
            jax.ShapeDtypeStruct((Bn, Ln, Hn), jnp.float32),
            jax.ShapeDtypeStruct((Bn, NH, Ln, Ln), jnp.float32),
        ),
        grid=(Bn,),
        in_specs=[
            pl.BlockSpec((1, Ln, Hn), lambda b: (b, 0, 0)),       # input_Q
            pl.BlockSpec((1, Ln, Hn), lambda b: (b, 0, 0)),       # input_K
            pl.BlockSpec((1, Ln, Hn), lambda b: (b, 0, 0)),       # input_V
            pl.BlockSpec((1, Ln, Ln), lambda b: (b, 0, 0)),       # attn_mask
            pl.BlockSpec((Hn, NH * DK), lambda b: (0, 0)),        # W_Q
            pl.BlockSpec((Hn, NH * DK), lambda b: (0, 0)),        # W_K
            pl.BlockSpec((Hn, NH * DV), lambda b: (0, 0)),        # W_V
            pl.BlockSpec((NH * DV, Hn), lambda b: (0, 0)),        # fc
        ],
        out_specs=(
            pl.BlockSpec((1, Ln, Hn), lambda b: (b, 0, 0)),
            pl.BlockSpec((1, NH, Ln, Ln), lambda b: (b, 0, 0, 0)),
        ),
        compiler_params=pltpu.CompilerParams(
            dimension_semantics=("parallel",)),   # v7x: batch split across TCs
    )(input_Q, input_K, input_V, mask_f, wq, wk, wv, wo)
    return out, attn


# --------------------------- pure-JAX reference -------------------------------
def mha_reference(input_Q, input_K, input_V, attn_mask, wq, wk, wv, wo):
    Bn, Ln, Hn = input_Q.shape
    q = (input_Q @ wq).reshape(Bn, Ln, NH, DK).transpose(0, 2, 1, 3)
    k = (input_K @ wk).reshape(Bn, Ln, NH, DK).transpose(0, 2, 1, 3)
    v = (input_V @ wv).reshape(Bn, Ln, NH, DV).transpose(0, 2, 1, 3)
    s = jnp.einsum("bhqd,bhkd->bhqk", q, k) * (1.0 / math.sqrt(DK))
    s = jnp.where(attn_mask[:, None, :, :], NEG_INF, s)
    attn = jax.nn.softmax(s, axis=-1)
    ctx = jnp.einsum("bhqk,bhkd->bhqd", attn, v)
    ctx = ctx.transpose(0, 2, 1, 3).reshape(Bn, Ln, NH * DV)
    out = ctx @ wo + input_Q
    mu = out.mean(-1, keepdims=True)
    var = ((out - mu) ** 2).mean(-1, keepdims=True)
    return (out - mu) * jax.lax.rsqrt(var + EPS), attn


# -------------------------------- main ----------------------------------------
if __name__ == "__main__":
    key = jax.random.PRNGKey(0)
    k_q, k_wq, k_wk, k_wv, k_wo = jax.random.split(key, 5)

    # Self-attention style inputs (the module accepts distinct Q/K/V inputs;
    # here they are the same tensor, as in the surrounding model).
    x = (0.1 * jax.random.normal(k_q, (B, L, H))).astype(jnp.float32)
    input_Q = input_K = input_V = x

    # Weights stored as [in, out] so y = x @ W (equivalent parameterization of
    # bias-free nn.Linear).
    wq = (0.05 * jax.random.normal(k_wq, (H, NH * DK))).astype(jnp.float32)
    wk = (0.05 * jax.random.normal(k_wk, (H, NH * DK))).astype(jnp.float32)
    wv = (0.05 * jax.random.normal(k_wv, (H, NH * DV))).astype(jnp.float32)
    wo = (0.05 * jax.random.normal(k_wo, (NH * DV, H))).astype(jnp.float32)

    # attn_mask [B, L, L] bool: causal (no peeking ahead) + key-padding on the
    # last two positions of batch 0.  True = masked (like the PyTorch module).
    causal = jnp.triu(jnp.ones((L, L), jnp.bool_), k=1)[None]           # [1,L,L]
    pad = jnp.array([[0] * (L - 2) + [1] * 2, [0] * L], dtype=jnp.bool_)
    attn_mask = causal | pad[:, None, :]                                 # [B,L,L]

    out, attn = multi_head_attention(input_Q, input_K, input_V, attn_mask,
                                     wq, wk, wv, wo)
    jax.block_until_ready((out, attn))

    out_ref, attn_ref = mha_reference(input_Q, input_K, input_V, attn_mask,
                                      wq, wk, wv, wo)

    assert out.shape == (B, L, H)
    assert attn.shape == (B, NH, L, L)
    assert bool(jnp.all(jnp.isfinite(out)))
    assert bool(jnp.allclose(attn, attn_ref, rtol=1e-4, atol=1e-4))
    assert bool(jnp.allclose(out, out_ref, rtol=1e-4, atol=2e-4))
    # attention rows are valid probability distributions
    assert bool(jnp.allclose(jnp.sum(attn, axis=-1), 1.0, atol=1e-5))

    print("KERNEL_OK")
</pallas_src>

<mosaic_0001>
module attributes {stable_mosaic.version = 11 : i64} {
  func.func @_mha_fused_kernel(%arg0: i32, %arg1: memref<1x8x32xf32, #tpu.memory_space<vmem>>, %arg2: memref<1x8x32xf32, #tpu.memory_space<vmem>>, %arg3: memref<1x8x32xf32, #tpu.memory_space<vmem>>, %arg4: memref<1x8x8xf32, #tpu.memory_space<vmem>>, %arg5: memref<32x32xf32, #tpu.memory_space<vmem>>, %arg6: memref<32x32xf32, #tpu.memory_space<vmem>>, %arg7: memref<32x32xf32, #tpu.memory_space<vmem>>, %arg8: memref<32x32xf32, #tpu.memory_space<vmem>>, %arg9: memref<1x8x32xf32, #tpu.memory_space<vmem>>, %arg10: memref<1x4x8x8xf32, #tpu.memory_space<vmem>>) attributes {dimension_semantics = [#tpu.dimension_semantics<parallel>], iteration_bounds = array<i64: 2>, scalar_prefetch = 0 : i64, scratch_operands = 0 : i64, tpu.core_type = #tpu.core_type<tc>, window_params = [{transform_indices = @transform_0, window_bounds = array<i64: 1, 8, 32>}, {transform_indices = @transform_1, window_bounds = array<i64: 1, 8, 32>}, {transform_indices = @transform_2, window_bounds = array<i64: 1, 8, 32>}, {transform_indices = @transform_3, window_bounds = array<i64: 1, 8, 8>}, {pipeline_mode = #tpu.pipeline_mode<synchronous>, transform_indices = @transform_4, window_bounds = array<i64: 32, 32>}, {pipeline_mode = #tpu.pipeline_mode<synchronous>, transform_indices = @transform_5, window_bounds = array<i64: 32, 32>}, {pipeline_mode = #tpu.pipeline_mode<synchronous>, transform_indices = @transform_6, window_bounds = array<i64: 32, 32>}, {pipeline_mode = #tpu.pipeline_mode<synchronous>, transform_indices = @transform_7, window_bounds = array<i64: 32, 32>}, {transform_indices = @transform_8, window_bounds = array<i64: 1, 8, 32>}, {transform_indices = @transform_9, window_bounds = array<i64: 1, 4, 8, 8>}]} {
    %c0 = arith.constant 0 : index
    %c0_0 = arith.constant 0 : index
    %c0_1 = arith.constant 0 : index
    %0 = vector.load %arg1[%c0, %c0_0, %c0_1] : memref<1x8x32xf32, #tpu.memory_space<vmem>>, vector<1x8x32xf32>
    %1 = vector.shape_cast %0 : vector<1x8x32xf32> to vector<8x32xf32>
    %c0_2 = arith.constant 0 : index
    %c0_3 = arith.constant 0 : index
    %c0_4 = arith.constant 0 : index
    %2 = vector.load %arg2[%c0_2, %c0_3, %c0_4] : memref<1x8x32xf32, #tpu.memory_space<vmem>>, vector<1x8x32xf32>
    %3 = vector.shape_cast %2 : vector<1x8x32xf32> to vector<8x32xf32>
    %c0_5 = arith.constant 0 : index
    %c0_6 = arith.constant 0 : index
    %c0_7 = arith.constant 0 : index
    %4 = vector.load %arg3[%c0_5, %c0_6, %c0_7] : memref<1x8x32xf32, #tpu.memory_space<vmem>>, vector<1x8x32xf32>
    %5 = vector.shape_cast %4 : vector<1x8x32xf32> to vector<8x32xf32>
    %c0_8 = arith.constant 0 : index
    %c0_9 = arith.constant 0 : index
    %c0_10 = arith.constant 0 : index
    %6 = vector.load %arg4[%c0_8, %c0_9, %c0_10] : memref<1x8x8xf32, #tpu.memory_space<vmem>>, vector<1x8x8xf32>
    %7 = vector.shape_cast %6 : vector<1x8x8xf32> to vector<8x8xf32>
    %c0_11 = arith.constant 0 : index
    %c0_12 = arith.constant 0 : index
    %8 = vector.load %arg8[%c0_11, %c0_12] : memref<32x32xf32, #tpu.memory_space<vmem>>, vector<32x32xf32>
    %c0_13 = arith.constant 0 : index
    %c0_14 = arith.constant 0 : index
    %9 = vector.load %arg5[%c0_13, %c0_14] : memref<32x32xf32, #tpu.memory_space<vmem>>, vector<32x32xf32>
    %cst = arith.constant dense<0.000000e+00> : vector<8x32xf32>
    %10 = tpu.matmul %1, %9, %cst {dimension_numbers = #tpu.dot_dimension_numbers<[1], [0], [0], [1], [0, 0, 1, 1], [], []>} : vector<8x32xf32>, vector<32x32xf32>, vector<8x32xf32> -> vector<8x32xf32>
    %c0_15 = arith.constant 0 : index
    %c0_16 = arith.constant 0 : index
    %11 = vector.load %arg6[%c0_15, %c0_16] : memref<32x32xf32, #tpu.memory_space<vmem>>, vector<32x32xf32>
    %cst_17 = arith.constant dense<0.000000e+00> : vector<8x32xf32>
    %12 = tpu.matmul %3, %11, %cst_17 {dimension_numbers = #tpu.dot_dimension_numbers<[1], [0], [0], [1], [0, 0, 1, 1], [], []>} : vector<8x32xf32>, vector<32x32xf32>, vector<8x32xf32> -> vector<8x32xf32>
    %c0_18 = arith.constant 0 : index
    %c0_19 = arith.constant 0 : index
    %13 = vector.load %arg7[%c0_18, %c0_19] : memref<32x32xf32, #tpu.memory_space<vmem>>, vector<32x32xf32>
    %cst_20 = arith.constant dense<0.000000e+00> : vector<8x32xf32>
    %14 = tpu.matmul %5, %13, %cst_20 {dimension_numbers = #tpu.dot_dimension_numbers<[1], [0], [0], [1], [0, 0, 1, 1], [], []>} : vector<8x32xf32>, vector<32x32xf32>, vector<8x32xf32> -> vector<8x32xf32>
    %15 = vector.extract_strided_slice %10 {offsets = [0, 0], sizes = [8, 8], strides = [1, 1]} : vector<8x32xf32> to vector<8x8xf32>
    %16 = vector.extract_strided_slice %12 {offsets = [0, 0], sizes = [8, 8], strides = [1, 1]} : vector<8x32xf32> to vector<8x8xf32>
    %17 = vector.extract_strided_slice %14 {offsets = [0, 0], sizes = [8, 8], strides = [1, 1]} : vector<8x32xf32> to vector<8x8xf32>
    %18 = tpu.transpose %16, [1, 0] : vector<8x8xf32> -> vector<8x8xf32>
    %cst_21 = arith.constant dense<0.000000e+00> : vector<8x8xf32>
    %19 = tpu.matmul %15, %18, %cst_21 {dimension_numbers = #tpu.dot_dimension_numbers<[1], [0], [0], [1], [0, 0, 1, 1], [], []>} : vector<8x8xf32>, vector<8x8xf32>, vector<8x8xf32> -> vector<8x8xf32>
    %cst_22 = arith.constant 0.353553385 : f32
    %20 = vector.broadcast %cst_22 : f32 to vector<8x8xf32>
    %21 = arith.mulf %19, %20 : vector<8x8xf32>
    %cst_23 = arith.constant 0.000000e+00 : f32
    %22 = vector.broadcast %cst_23 : f32 to vector<8x8xf32>
    %23 = arith.cmpf ogt, %7, %22 : vector<8x8xf32>
    %cst_24 = arith.constant -1.000000e+09 : f32
    %24 = vector.broadcast %cst_24 : f32 to vector<8x8xf32>
    %25 = arith.select %23, %24, %21 : vector<8x8xi1>, vector<8x8xf32>
    %cst_25 = arith.constant dense<0xFF800000> : vector<8xf32>
    %26 = vector.multi_reduction <maximumf>, %25, %cst_25 [1] : vector<8x8xf32> to vector<8xf32>
    %27 = vector.shape_cast %26 : vector<8xf32> to vector<8x1xf32>
    %28 = vector.broadcast %27 : vector<8x1xf32> to vector<8x8xf32>
    %29 = arith.subf %25, %28 : vector<8x8xf32>
    %30 = math.exp %29 : vector<8x8xf32>
    %cst_26 = arith.constant dense<0.000000e+00> : vector<8xf32>
    %31 = vector.multi_reduction <add>, %30, %cst_26 [1] : vector<8x8xf32> to vector<8xf32>
    %32 = vector.shape_cast %31 : vector<8xf32> to vector<8x1xf32>
    %33 = vector.broadcast %32 : vector<8x1xf32> to vector<8x8xf32>
    %34 = arith.divf %30, %33 : vector<8x8xf32>
    %c0_27 = arith.constant 0 : index
    %c0_28 = arith.constant 0 : index
    %c0_29 = arith.constant 0 : index
    %c0_30 = arith.constant 0 : index
    %35 = vector.load %arg10[%c0_27, %c0_28, %c0_29, %c0_30] : memref<1x4x8x8xf32, #tpu.memory_space<vmem>>, vector<1x1x8x8xf32>
    %36 = vector.shape_cast %35 : vector<1x1x8x8xf32> to vector<8x8xf32>
    %37 = vector.shape_cast %34 : vector<8x8xf32> to vector<1x1x8x8xf32>
    tpu.vector_store %arg10[%c0_27, %c0_28, %c0_29, %c0_30], %37 {strides = array<i32>} : memref<1x4x8x8xf32, #tpu.memory_space<vmem>>, vector<1x1x8x8xf32>,
    %cst_31 = arith.constant dense<0.000000e+00> : vector<8x8xf32>
    %38 = tpu.matmul %34, %17, %cst_31 {dimension_numbers = #tpu.dot_dimension_numbers<[1], [0], [0], [1], [0, 0, 1, 1], [], []>} : vector<8x8xf32>, vector<8x8xf32>, vector<8x8xf32> -> vector<8x8xf32>
    %39 = vector.extract_strided_slice %8 {offsets = [0, 0], sizes = [8, 32], strides = [1, 1]} : vector<32x32xf32> to vector<8x32xf32>
    %cst_32 = arith.constant dense<0.000000e+00> : vector<8x32xf32>
    %40 = tpu.matmul %38, %39, %cst_32 {dimension_numbers = #tpu.dot_dimension_numbers<[1], [0], [0], [1], [0, 0, 1, 1], [], []>} : vector<8x8xf32>, vector<8x32xf32>, vector<8x32xf32> -> vector<8x32xf32>
    %41 = arith.addf %1, %40 : vector<8x32xf32>
    %42 = vector.extract_strided_slice %10 {offsets = [0, 8], sizes = [8, 8], strides = [1, 1]} : vector<8x32xf32> to vector<8x8xf32>
    %43 = vector.extract_strided_slice %12 {offsets = [0, 8], sizes = [8, 8], strides = [1, 1]} : vector<8x32xf32> to vector<8x8xf32>
    %44 = vector.extract_strided_slice %14 {offsets = [0, 8], sizes = [8, 8], strides = [1, 1]} : vector<8x32xf32> to vector<8x8xf32>
    %45 = tpu.transpose %43, [1, 0] : vector<8x8xf32> -> vector<8x8xf32>
    %cst_33 = arith.constant dense<0.000000e+00> : vector<8x8xf32>
    %46 = tpu.matmul %42, %45, %cst_33 {dimension_numbers = #tpu.dot_dimension_numbers<[1], [0], [0], [1], [0, 0, 1, 1], [], []>} : vector<8x8xf32>, vector<8x8xf32>, vector<8x8xf32> -> vector<8x8xf32>
    %cst_34 = arith.constant 0.353553385 : f32
    %47 = vector.broadcast %cst_34 : f32 to vector<8x8xf32>
    %48 = arith.mulf %46, %47 : vector<8x8xf32>
    %cst_35 = arith.constant 0.000000e+00 : f32
    %49 = vector.broadcast %cst_35 : f32 to vector<8x8xf32>
    %50 = arith.cmpf ogt, %7, %49 : vector<8x8xf32>
    %cst_36 = arith.constant -1.000000e+09 : f32
    %51 = vector.broadcast %cst_36 : f32 to vector<8x8xf32>
    %52 = arith.select %50, %51, %48 : vector<8x8xi1>, vector<8x8xf32>
    %cst_37 = arith.constant dense<0xFF800000> : vector<8xf32>
    %53 = vector.multi_reduction <maximumf>, %52, %cst_37 [1] : vector<8x8xf32> to vector<8xf32>
    %54 = vector.shape_cast %53 : vector<8xf32> to vector<8x1xf32>
    %55 = vector.broadcast %54 : vector<8x1xf32> to vector<8x8xf32>
    %56 = arith.subf %52, %55 : vector<8x8xf32>
    %57 = math.exp %56 : vector<8x8xf32>
    %cst_38 = arith.constant dense<0.000000e+00> : vector<8xf32>
    %58 = vector.multi_reduction <add>, %57, %cst_38 [1] : vector<8x8xf32> to vector<8xf32>
    %59 = vector.shape_cast %58 : vector<8xf32> to vector<8x1xf32>
    %60 = vector.broadcast %59 : vector<8x1xf32> to vector<8x8xf32>
    %61 = arith.divf %57, %60 : vector<8x8xf32>
    %c0_39 = arith.constant 0 : index
    %c1 = arith.constant 1 : index
    %c0_40 = arith.constant 0 : index
    %c0_41 = arith.constant 0 : index
    %62 = vector.load %arg10[%c0_39, %c1, %c0_40, %c0_41] : memref<1x4x8x8xf32, #tpu.memory_space<vmem>>, vector<1x1x8x8xf32>
    %63 = vector.shape_cast %62 : vector<1x1x8x8xf32> to vector<8x8xf32>
    %64 = vector.shape_cast %61 : vector<8x8xf32> to vector<1x1x8x8xf32>
    tpu.vector_store %arg10[%c0_39, %c1, %c0_40, %c0_41], %64 {strides = array<i32>} : memref<1x4x8x8xf32, #tpu.memory_space<vmem>>, vector<1x1x8x8xf32>,
    %cst_42 = arith.constant dense<0.000000e+00> : vector<8x8xf32>
    %65 = tpu.matmul %61, %44, %cst_42 {dimension_numbers = #tpu.dot_dimension_numbers<[1], [0], [0], [1], [0, 0, 1, 1], [], []>} : vector<8x8xf32>, vector<8x8xf32>, vector<8x8xf32> -> vector<8x8xf32>
    %66 = vector.extract_strided_slice %8 {offsets = [8, 0], sizes = [8, 32], strides = [1, 1]} : vector<32x32xf32> to vector<8x32xf32>
    %cst_43 = arith.constant dense<0.000000e+00> : vector<8x32xf32>
    %67 = tpu.matmul %65, %66, %cst_43 {dimension_numbers = #tpu.dot_dimension_numbers<[1], [0], [0], [1], [0, 0, 1, 1], [], []>} : vector<8x8xf32>, vector<8x32xf32>, vector<8x32xf32> -> vector<8x32xf32>
    %68 = arith.addf %41, %67 : vector<8x32xf32>
    %69 = vector.extract_strided_slice %10 {offsets = [0, 16], sizes = [8, 8], strides = [1, 1]} : vector<8x32xf32> to vector<8x8xf32>
    %70 = vector.extract_strided_slice %12 {offsets = [0, 16], sizes = [8, 8], strides = [1, 1]} : vector<8x32xf32> to vector<8x8xf32>
    %71 = vector.extract_strided_slice %14 {offsets = [0, 16], sizes = [8, 8], strides = [1, 1]} : vector<8x32xf32> to vector<8x8xf32>
    %72 = tpu.transpose %70, [1, 0] : vector<8x8xf32> -> vector<8x8xf32>
    %cst_44 = arith.constant dense<0.000000e+00> : vector<8x8xf32>
    %73 = tpu.matmul %69, %72, %cst_44 {dimension_numbers = #tpu.dot_dimension_numbers<[1], [0], [0], [1], [0, 0, 1, 1], [], []>} : vector<8x8xf32>, vector<8x8xf32>, vector<8x8xf32> -> vector<8x8xf32>
    %cst_45 = arith.constant 0.353553385 : f32
    %74 = vector.broadcast %cst_45 : f32 to vector<8x8xf32>
    %75 = arith.mulf %73, %74 : vector<8x8xf32>
    %cst_46 = arith.constant 0.000000e+00 : f32
    %76 = vector.broadcast %cst_46 : f32 to vector<8x8xf32>
    %77 = arith.cmpf ogt, %7, %76 : vector<8x8xf32>
    %cst_47 = arith.constant -1.000000e+09 : f32
    %78 = vector.broadcast %cst_47 : f32 to vector<8x8xf32>
    %79 = arith.select %77, %78, %75 : vector<8x8xi1>, vector<8x8xf32>
    %cst_48 = arith.constant dense<0xFF800000> : vector<8xf32>
    %80 = vector.multi_reduction <maximumf>, %79, %cst_48 [1] : vector<8x8xf32> to vector<8xf32>
    %81 = vector.shape_cast %80 : vector<8xf32> to vector<8x1xf32>
    %82 = vector.broadcast %81 : vector<8x1xf32> to vector<8x8xf32>
    %83 = arith.subf %79, %82 : vector<8x8xf32>
    %84 = math.exp %83 : vector<8x8xf32>
    %cst_49 = arith.constant dense<0.000000e+00> : vector<8xf32>
    %85 = vector.multi_reduction <add>, %84, %cst_49 [1] : vector<8x8xf32> to vector<8xf32>
    %86 = vector.shape_cast %85 : vector<8xf32> to vector<8x1xf32>
    %87 = vector.broadcast %86 : vector<8x1xf32> to vector<8x8xf32>
    %88 = arith.divf %84, %87 : vector<8x8xf32>
    %c0_50 = arith.constant 0 : index
    %c2 = arith.constant 2 : index
    %c0_51 = arith.constant 0 : index
    %c0_52 = arith.constant 0 : index
    %89 = vector.load %arg10[%c0_50, %c2, %c0_51, %c0_52] : memref<1x4x8x8xf32, #tpu.memory_space<vmem>>, vector<1x1x8x8xf32>
    %90 = vector.shape_cast %89 : vector<1x1x8x8xf32> to vector<8x8xf32>
    %91 = vector.shape_cast %88 : vector<8x8xf32> to vector<1x1x8x8xf32>
    tpu.vector_store %arg10[%c0_50, %c2, %c0_51, %c0_52], %91 {strides = array<i32>} : memref<1x4x8x8xf32, #tpu.memory_space<vmem>>, vector<1x1x8x8xf32>,
    %cst_53 = arith.constant dense<0.000000e+00> : vector<8x8xf32>
    %92 = tpu.matmul %88, %71, %cst_53 {dimension_numbers = #tpu.dot_dimension_numbers<[1], [0], [0], [1], [0, 0, 1, 1], [], []>} : vector<8x8xf32>, vector<8x8xf32>, vector<8x8xf32> -> vector<8x8xf32>
    %93 = vector.extract_strided_slice %8 {offsets = [16, 0], sizes = [8, 32], strides = [1, 1]} : vector<32x32xf32> to vector<8x32xf32>
    %cst_54 = arith.constant dense<0.000000e+00> : vector<8x32xf32>
    %94 = tpu.matmul %92, %93, %cst_54 {dimension_numbers = #tpu.dot_dimension_numbers<[1], [0], [0], [1], [0, 0, 1, 1], [], []>} : vector<8x8xf32>, vector<8x32xf32>, vector<8x32xf32> -> vector<8x32xf32>
    %95 = arith.addf %68, %94 : vector<8x32xf32>
    %96 = vector.extract_strided_slice %10 {offsets = [0, 24], sizes = [8, 8], strides = [1, 1]} : vector<8x32xf32> to vector<8x8xf32>
    %97 = vector.extract_strided_slice %12 {offsets = [0, 24], sizes = [8, 8], strides = [1, 1]} : vector<8x32xf32> to vector<8x8xf32>
    %98 = vector.extract_strided_slice %14 {offsets = [0, 24], sizes = [8, 8], strides = [1, 1]} : vector<8x32xf32> to vector<8x8xf32>
    %99 = tpu.transpose %97, [1, 0] : vector<8x8xf32> -> vector<8x8xf32>
    %cst_55 = arith.constant dense<0.000000e+00> : vector<8x8xf32>
    %100 = tpu.matmul %96, %99, %cst_55 {dimension_numbers = #tpu.dot_dimension_numbers<[1], [0], [0], [1], [0, 0, 1, 1], [], []>} : vector<8x8xf32>, vector<8x8xf32>, vector<8x8xf32> -> vector<8x8xf32>
    %cst_56 = arith.constant 0.353553385 : f32
    %101 = vector.broadcast %cst_56 : f32 to vector<8x8xf32>
    %102 = arith.mulf %100, %101 : vector<8x8xf32>
    %cst_57 = arith.constant 0.000000e+00 : f32
    %103 = vector.broadcast %cst_57 : f32 to vector<8x8xf32>
    %104 = arith.cmpf ogt, %7, %103 : vector<8x8xf32>
    %cst_58 = arith.constant -1.000000e+09 : f32
    %105 = vector.broadcast %cst_58 : f32 to vector<8x8xf32>
    %106 = arith.select %104, %105, %102 : vector<8x8xi1>, vector<8x8xf32>
    %cst_59 = arith.constant dense<0xFF800000> : vector<8xf32>
    %107 = vector.multi_reduction <maximumf>, %106, %cst_59 [1] : vector<8x8xf32> to vector<8xf32>
    %108 = vector.shape_cast %107 : vector<8xf32> to vector<8x1xf32>
    %109 = vector.broadcast %108 : vector<8x1xf32> to vector<8x8xf32>
    %110 = arith.subf %106, %109 : vector<8x8xf32>
    %111 = math.exp %110 : vector<8x8xf32>
    %cst_60 = arith.constant dense<0.000000e+00> : vector<8xf32>
    %112 = vector.multi_reduction <add>, %111, %cst_60 [1] : vector<8x8xf32> to vector<8xf32>
    %113 = vector.shape_cast %112 : vector<8xf32> to vector<8x1xf32>
    %114 = vector.broadcast %113 : vector<8x1xf32> to vector<8x8xf32>
    %115 = arith.divf %111, %114 : vector<8x8xf32>
    %c0_61 = arith.constant 0 : index
    %c3 = arith.constant 3 : index
    %c0_62 = arith.constant 0 : index
    %c0_63 = arith.constant 0 : index
    %116 = vector.load %arg10[%c0_61, %c3, %c0_62, %c0_63] : memref<1x4x8x8xf32, #tpu.memory_space<vmem>>, vector<1x1x8x8xf32>
    %117 = vector.shape_cast %116 : vector<1x1x8x8xf32> to vector<8x8xf32>
    %118 = vector.shape_cast %115 : vector<8x8xf32> to vector<1x1x8x8xf32>
    tpu.vector_store %arg10[%c0_61, %c3, %c0_62, %c0_63], %118 {strides = array<i32>} : memref<1x4x8x8xf32, #tpu.memory_space<vmem>>, vector<1x1x8x8xf32>,
    %cst_64 = arith.constant dense<0.000000e+00> : vector<8x8xf32>
    %119 = tpu.matmul %115, %98, %cst_64 {dimension_numbers = #tpu.dot_dimension_numbers<[1], [0], [0], [1], [0, 0, 1, 1], [], []>} : vector<8x8xf32>, vector<8x8xf32>, vector<8x8xf32> -> vector<8x8xf32>
    %120 = vector.extract_strided_slice %8 {offsets = [24, 0], sizes = [8, 32], strides = [1, 1]} : vector<32x32xf32> to vector<8x32xf32>
    %cst_65 = arith.constant dense<0.000000e+00> : vector<8x32xf32>
    %121 = tpu.matmul %119, %120, %cst_65 {dimension_numbers = #tpu.dot_dimension_numbers<[1], [0], [0], [1], [0, 0, 1, 1], [], []>} : vector<8x8xf32>, vector<8x32xf32>, vector<8x32xf32> -> vector<8x32xf32>
    %122 = arith.addf %95, %121 : vector<8x32xf32>
    %cst_66 = arith.constant dense<0.000000e+00> : vector<8xf32>
    %123 = vector.multi_reduction <add>, %122, %cst_66 [1] : vector<8x32xf32> to vector<8xf32>
    %124 = vector.shape_cast %123 : vector<8xf32> to vector<8x1xf32>
    %cst_67 = arith.constant 3.200000e+01 : f32
    %125 = vector.broadcast %cst_67 : f32 to vector<8x1xf32>
    %126 = arith.divf %124, %125 : vector<8x1xf32>
    %127 = vector.broadcast %126 : vector<8x1xf32> to vector<8x32xf32>
    %128 = arith.subf %122, %127 : vector<8x32xf32>
    %129 = arith.mulf %128, %128 : vector<8x32xf32>
    %cst_68 = arith.constant dense<0.000000e+00> : vector<8xf32>
    %130 = vector.multi_reduction <add>, %129, %cst_68 [1] : vector<8x32xf32> to vector<8xf32>
    %131 = vector.shape_cast %130 : vector<8xf32> to vector<8x1xf32>
    %cst_69 = arith.constant 3.200000e+01 : f32
    %132 = vector.broadcast %cst_69 : f32 to vector<8x1xf32>
    %133 = arith.divf %131, %132 : vector<8x1xf32>
    %134 = vector.broadcast %126 : vector<8x1xf32> to vector<8x32xf32>
    %135 = arith.subf %122, %134 : vector<8x32xf32>
    %cst_70 = arith.constant 9.99999974E-6 : f32
    %136 = vector.broadcast %cst_70 : f32 to vector<8x1xf32>
    %137 = arith.addf %133, %136 : vector<8x1xf32>
    %138 = math.rsqrt %137 : vector<8x1xf32>
    %139 = vector.broadcast %138 : vector<8x1xf32> to vector<8x32xf32>
    %140 = arith.mulf %135, %139 : vector<8x32xf32>
    %c0_71 = arith.constant 0 : index
    %c0_72 = arith.constant 0 : index
    %c0_73 = arith.constant 0 : index
    %141 = vector.load %arg9[%c0_71, %c0_72, %c0_73] : memref<1x8x32xf32, #tpu.memory_space<vmem>>, vector<1x8x32xf32>
    %142 = vector.shape_cast %141 : vector<1x8x32xf32> to vector<8x32xf32>
    %143 = vector.shape_cast %140 : vector<8x32xf32> to vector<1x8x32xf32>
    tpu.vector_store %arg9[%c0_71, %c0_72, %c0_73], %143 {strides = array<i32>} : memref<1x8x32xf32, #tpu.memory_space<vmem>>, vector<1x8x32xf32>,
    return
  }
  func.func @transform_0(%arg0: i32) -> (i32, i32, i32) {
    %c0_i32 = arith.constant 0 : i32
    %c0_i32_0 = arith.constant 0 : i32
    %c0_i32_1 = arith.constant 0 : i32
    return %arg0, %c0_i32, %c0_i32_0 : i32, i32, i32
  }
  func.func @transform_1(%arg0: i32) -> (i32, i32, i32) {
    %c0_i32 = arith.constant 0 : i32
    %c0_i32_0 = arith.constant 0 : i32
    %c0_i32_1 = arith.constant 0 : i32
    return %arg0, %c0_i32, %c0_i32_0 : i32, i32, i32
  }
  func.func @transform_2(%arg0: i32) -> (i32, i32, i32) {
    %c0_i32 = arith.constant 0 : i32
    %c0_i32_0 = arith.constant 0 : i32
    %c0_i32_1 = arith.constant 0 : i32
    return %arg0, %c0_i32, %c0_i32_0 : i32, i32, i32
  }
  func.func @transform_3(%arg0: i32) -> (i32, i32, i32) {
    %c0_i32 = arith.constant 0 : i32
    %c0_i32_0 = arith.constant 0 : i32
    %c0_i32_1 = arith.constant 0 : i32
    return %arg0, %c0_i32, %c0_i32_0 : i32, i32, i32
  }
  func.func @transform_4(%arg0: i32) -> (i32, i32) {
    %c0_i32 = arith.constant 0 : i32
    %c0_i32_0 = arith.constant 0 : i32
    %c0_i32_1 = arith.constant 0 : i32
    return %c0_i32, %c0_i32_0 : i32, i32
  }
  func.func @transform_5(%arg0: i32) -> (i32, i32) {
    %c0_i32 = arith.constant 0 : i32
    %c0_i32_0 = arith.constant 0 : i32
    %c0_i32_1 = arith.constant 0 : i32
    return %c0_i32, %c0_i32_0 : i32, i32
  }
  func.func @transform_6(%arg0: i32) -> (i32, i32) {
    %c0_i32 = arith.constant 0 : i32
    %c0_i32_0 = arith.constant 0 : i32
    %c0_i32_1 = arith.constant 0 : i32
    return %c0_i32, %c0_i32_0 : i32, i32
  }
  func.func @transform_7(%arg0: i32) -> (i32, i32) {
    %c0_i32 = arith.constant 0 : i32
    %c0_i32_0 = arith.constant 0 : i32
    %c0_i32_1 = arith.constant 0 : i32
    return %c0_i32, %c0_i32_0 : i32, i32
  }
  func.func @transform_8(%arg0: i32) -> (i32, i32, i32) {
    %c0_i32 = arith.constant 0 : i32
    %c0_i32_0 = arith.constant 0 : i32
    %c0_i32_1 = arith.constant 0 : i32
    return %arg0, %c0_i32, %c0_i32_0 : i32, i32, i32
  }
  func.func @transform_9(%arg0: i32) -> (i32, i32, i32, i32) {
    %c0_i32 = arith.constant 0 : i32
    %c0_i32_0 = arith.constant 0 : i32
    %c0_i32_1 = arith.constant 0 : i32
    %c0_i32_2 = arith.constant 0 : i32
    return %arg0, %c0_i32, %c0_i32_0, %c0_i32_1 : i32, i32, i32, i32
  }
}

</mosaic_0001>

<bundles_post_ra>
// kernel: multi_head_attention.1
= control target key start
LH: loop header
LB: loop body
LE: loop exit
PB: predicated region body
PF: predicated region fallthrough
CT: control target
= control target key end

     0   :  { %s3031_s0 = inlined_call_operand.hbm [shape: f32[2,8,32], index: 0, kind: input, shape index: {}]   ;;  %s3032_s1 = inlined_call_operand.hbm [shape: f32[2,8,32], index: 1, kind: input, shape index: {}]   ;;  %s3033_s2 = inlined_call_operand.hbm [shape: f32[2,8,32], index: 2, kind: input, shape index: {}]   ;;  %s3034_s3 = inlined_call_operand.vmem [shape: f32[2,8,8], index: 3, kind: input, shape index: {}]   ;;  %s3035_s4 = inlined_call_operand.hbm [shape: f32[32,32], index: 4, kind: input, shape index: {}]   ;;  %s3036_s5 = inlined_call_operand.hbm [shape: f32[32,32], index: 5, kind: input, shape index: {}]   ;;  %s3037_s6 = inlined_call_operand.hbm [shape: f32[32,32], index: 6, kind: input, shape index: {}]   ;;  %s3038_s7 = inlined_call_operand.vmem [shape: f32[32,32], index: 7, kind: input, shape index: {}]   ;;  %s3039_s8 = inlined_call_operand.hbm [shape: f32[2,8,32], index: 8, kind: output, shape index: {0}]   ;;  %s3040_s9 = inlined_call_operand.hbm [shape: f32[2,4,8,8], index: 9, kind: output, shape index: {1}]  }
   0x1   :  { %3060 = sst [smem:[#allocation27_spill]] %s3032_s1 }
   0x2   :  { %3061 = sst [smem:[#allocation28_spill]] %s3035_s4 }
   0x3   :  { %3062 = sst [smem:[#allocation29_spill]] %s3039_s8 }
   0x4   :  { %3063 = sst [smem:[#allocation30_spill]] %s3040_s9 }
   0x5   :  { %15 = vsyncpa [#allocation3], 0 }
   0x6   :  { %17 = vsyncpa [#allocation3 + $0x1], 0 }
   0x7   :  { %18 = vsyncpa [#allocation6], 0 }
   0x8   :  { %20 = vsyncpa [#allocation6 + $0x1], 0 }
   0x9   :  { %21 = vsyncpa [#allocation9], 0 }
   0xa   :  { %22 = vsyncpa [#allocation12], 0 }
   0xb   :  { %23 = vsyncpa [#allocation4], 0 }
   0xc   :  { %25 = vsyncpa [#allocation4 + $0x1], 0 }
   0xd   :  { %26 = vsyncpa [#allocation15], 0 }
   0xe   :  { %28 = vsyncpa [#allocation15 + $0x1], 0  ;;  %s2576_s30 = smov 0   ;;  %s2578_s10 = smov 0  }
   0xf   :  { %s2580_s11 = smov 0   ;;  %s2582_s12 = smov 0  }
  0x10 LB: > { %3064 = sst [smem:[#allocation22_spill]] %s2495_s30  ;;  %s2597_s13 = sadd.s32 4294967295, %s2507_s12   ;;  %s2507_s12 = sphi %s2582_s12, %s3098_s12   ;;  %s2503_s11 = sphi %s2580_s11, %s3102_s11   ;;  %s2499_s10 = sphi %s2578_s10, %s3101_s10   ;;  %s2495_s30 = sphi %s2576_s30, %s3100_s30  }
  0x11   : > { %3065 = sst [smem:[#allocation23_spill]] %s2507_s12  ;;  %s1936_s14 = sadd.s32 4294967294, %s2507_s12  }
  0x12   : > { %p54_p0 = scmp.ne.s32.totalorder %s2499_s10, %s2495_s30  ;;  %p3050_p1 = scmp.eq.s32.totalorder %s2597_s13, 0 }
  0x13   : > { %p240_p2 = scmp.eq.s32.totalorder %s2597_s13, 1  ;;  %p246_p3 = scmp.eq.s32.totalorder %s1936_s14, 1 }
  0x14   : > { %p2606_p4 = por %p3050_p1, %p54_p0  ;;  %p1937_p5 = scmp.ge.s32.totalorder %s2507_s12, 1 }
  0x15   : > { %p2611_p6 = por %p246_p3, %p54_p0  ;;  %p279_p7 = scmp.lt.s32.totalorder %s2507_s12, 3 }
  0x16   : > { %s3066_s15 = scalar_select %p2606_p4, 1, 0 }
  0x17   : > { %s3067_s16 = scalar_select %p2611_p6, 1, 0 }
  0x18   : > { %p2616_p8 = pnand %p1937_p5, %p279_p7  ;;  %s2509_s18 = smov [#allocation8]  }
  0x19   : > { %3068 = sst [smem:[#allocation24_spill]] %s3067_s16  ;;  %s291_s19 = sshll.u32 %s2509_s18, 4  ;;  %s292_s19 = int_to_ptr.vmem [resolvable:$true] %s291_s19 }
  0x1a   : > { %s3069_s17 = scalar_select %p2616_p8, 1, 0 }
  0x1b   : > { %p2142_p9 = pneg %p2616_p8  ;;  %s2630_s21 = sadd.s32 1, %s2507_s12  }
  0x1c   : > { %3071 = sst [smem:[#allocation25_spill]] %s2630_s21  ;;  %s41_s22 = sadd.s32 1, %s2503_s11 }
  0x1d   : > { %p2625_p11 = pnand %p2142_p9, %p3050_p1  ;;  %s38_s23 = ssub.s32 %s2507_s12, %s2630_s21 }
  0x1e   : > { %s2250_s24 = scalar_lea.vmem %s292_s19, 512  ;;  %p2258_p5 = scmp.lt.s32.totalorder %s292_s19, %s292_s19 }
  0x1f   : > { %s3070_s20 = scalar_select %p2625_p11, 1, 0 }
  0x20   : > { %p3051_p12 = pneg %p2625_p11  ;;  %p2251_p13 = scmp.ne.s32.totalorder %s292_s19, %s2250_s24 }
  0x21   : > { %p2259_p7 = scmp.lt.s32.totalorder %s2250_s24, %s2250_s24 }
  0x22   : > { %p2253_p0 = pnand %p2251_p13, %p3051_p12 }
  0x23   : > { %p2260_p9 = por %p2259_p7, %p2258_p5 }
  0x24   : > { %p2254_p3 = pneg %p2253_p0 }
  0x26   : > { %p2261_p10 = pnand %p2260_p9, %p2254_p3 }
  0x28   : > { %2264 = shalt.err (!%p2261_p10)
}
  0x29   : > { %s3043_s25 = smov 128   ;;  %s3045_s26 = smov 8  }
  0x2a   : > { %s3072_s4 = sld [smem:[#allocation28_spill]]  ;;  %p39_p10 = scmp.eq.s32.totalorder %s38_s23, 0 }
  0x2b   : > { %p48_p13 = scmp.ne.s32.totalorder %s2503_s11, %s2499_s10  ;;  %p49_p0 = scmp.eq.s32.totalorder %s2507_s12, 0 }
  0x2c   : > { %p2172_p3 = scmp.lt.s32.totalorder %s2507_s12, 2  ;;  %s3047_s18 = sand.u32 1, %s2503_s11  }
  0x2d   : > { %s2653_s29 = scalar_select %p39_p10, %s2503_s11, %s41_s22  }
  0x2e   : > { %p50_p5 = por %p49_p0, %p48_p13  ;;  %p2657_p7 = por %p240_p2, %p48_p13 }
  0x2f   : > { %3073 = sst [smem:[#allocation26_spill]] %s2653_s29  ;;  %s2663_s24 = sshll.u32 %s2507_s12, 7 }
  0x30   : > { %2145 = dma.hbm_to_vmem [thread:$0]  (!%p2625_p11), %s3072_s4, 512, %s292_s19, [#allocation9], %s3043_s25, %s3043_s25, %s3045_s26  }
  0x31   : > { %s3074_s14 = scalar_select %p2657_p7, 1, 0 }
  0x32   : > { %s2667_s21 = sshll.u32 %s3047_s18, 3  ;;  %p2669_p9 = pnand %p2172_p3, %p50_p5 }
  0x33   : > { %s352_s22 = sand.u32 1, %s2507_s12   ;;  %s3076_s1 = sld [smem:[#allocation27_spill]] }
  0x34   : > { %s356_s25 = scalar_lea.vmem [#allocation5], %s2667_s21  ;;  %s2681_s18 = scalar_lea.sflag [#allocation6], %s352_s22 }
  0x35   : > { %s363_s26 = sshll.u32 %s356_s25, 4  ;;  %p2687_p10 = pneg %p2669_p9  ;;  %s364_s26 = int_to_ptr.vmem [resolvable:$true] %s363_s26 }
  0x39   : > { %s2678_s28 = scalar_lea.hbm %s3076_s1, %s2663_s24  ;;  %s2270_s12 = scalar_lea.hbm %s3076_s1, 256 }
  0x3a   : > { %s2265_s4 = scalar_lea.hbm %s2678_s28, 128  ;;  %p2271_p3 = scmp.lt.s32.totalorder %s2678_s28, %s3076_s1 }
  0x3b   : > { %p2266_p2 = scmp.ne.s32.totalorder %s2678_s28, %s2265_s4  ;;  %p2272_p5 = scmp.lt.s32.totalorder %s2270_s12, %s2265_s4 }
  0x3d   : > { %p2268_p13 = pnand %p2687_p10, %p2266_p2  ;;  %p2273_p1 = por %p2272_p5, %p2271_p3 }
  0x3f   : > { %p2269_p0 = pneg %p2268_p13 }
  0x41   : > { %p2274_p12 = pnand %p2273_p1, %p2269_p0 }
  0x43   : > { %2277 = shalt.err (!%p2274_p12)
}
  0x44   : > { %s2278_s22 = scalar_lea.vmem %s364_s26, 128  ;;  %s2512_s30 = smov [#allocation5]  }
  0x45   : > { %p2279_p6 = scmp.ne.s32.totalorder %s364_s26, %s2278_s22  ;;  %s2283_s8 = sshll.u32 %s2512_s30, 4  ;;  %s2284_s8 = int_to_ptr.vmem [resolvable:$false] %s2283_s8 }
  0x46   : > { %s2285_s9 = scalar_lea.vmem %s2284_s8, 256  ;;  %p2286_p2 = scmp.lt.s32.totalorder %s364_s26, %s2284_s8 }
  0x47   : > { %p2281_p7 = pnand %p2279_p6, %p2687_p10  ;;  %p2287_p13 = scmp.lt.s32.totalorder %s2285_s9, %s2278_s22 }
  0x49   : > { %p2282_p4 = pneg %p2281_p7  ;;  %p2288_p8 = por %p2287_p13, %p2286_p2 }
  0x4b   : > { %p2289_p11 = pnand %p2288_p8, %p2282_p4 }
  0x4d   : > { %2292 = shalt.err (!%p2289_p11)
}
  0x4e   : > { %2158 = dma.hbm_to_vmem [thread:$0]  (!%p2669_p9), %s2678_s28, 128, %s364_s26, %s2681_s18  }
  0x4f   : > { %s2513_s4 = smov [#allocation10]   ;;  %s2514_s16 = smov [#allocation11]  }
  0x50   : > { %s304_s12 = sshll.u32 %s2513_s4, 4  ;;  %s317_s23 = sshll.u32 %s2514_s16, 4  ;;  %s305_s12 = int_to_ptr.vmem [resolvable:$true] %s304_s12  ;;  %s318_s23 = int_to_ptr.vmem [resolvable:$true] %s317_s23 }
  0x51   : > { %s2304_s27 = scalar_lea.vmem %s305_s12, 512  ;;  %p3078_p6 = scmp.ne.s32.totalorder %s3070_s20, 0 }
  0x52   : > { %p2305_p1 = scmp.ne.s32.totalorder %s305_s12, %s2304_s27  ;;  %p2312_p3 = scmp.lt.s32.totalorder %s305_s12, %s305_s12 }
  0x53   : > { %p3079_p12 = pneg %p3078_p6  ;;  %p2313_p4 = scmp.lt.s32.totalorder %s2304_s27, %s2304_s27 }
  0x55   : > { %p2307_p7 = pnand %p2305_p1, %p3079_p12  ;;  %p2314_p8 = por %p2313_p4, %p2312_p3 }
  0x57   : > { %p2308_p0 = pneg %p2307_p7 }
  0x59   : > { %p2315_p11 = pnand %p2314_p8, %p2308_p0 }
  0x5b   : > { %2318 = shalt.err (!%p2315_p11)
}
  0x5c   : > { %s3080_s8 = smov 8   ;;  %s3081_s9 = smov 128  }
  0x5d   : > { %2148 = dma.hbm_to_vmem [thread:$0]  (!%p3078_p6), %s3036_s5, 512, %s305_s12, [#allocation9], %s3081_s9, %s3081_s9, %s3080_s8  }
  0x5e   : > { %s2330_s28 = scalar_lea.vmem %s318_s23, 512  ;;  %p3082_p2 = pmov %p3079_p12 }
  0x5f   : > { %p2331_p5 = scmp.ne.s32.totalorder %s318_s23, %s2330_s28  ;;  %p2338_p12 = scmp.lt.s32.totalorder %s318_s23, %s318_s23 }
  0x60   : > { %p2339_p7 = scmp.lt.s32.totalorder %s2330_s28, %s2330_s28 }
  0x61   : > { %p2333_p13 = pnand %p2331_p5, %p3082_p2 }
  0x62   : > { %p2340_p0 = por %p2339_p7, %p2338_p12 }
  0x63   : > { %p2334_p1 = pneg %p2333_p13 }
  0x65   : > { %p2341_p3 = pnand %p2340_p0, %p2334_p1 }
  0x67   : > { %2344 = shalt.err (!%p2341_p3)
}
  0x68   : > { %2151 = dma.hbm_to_vmem [thread:$0]  (!%p3078_p6), %s3037_s6, 512, %s318_s23, [#allocation12], %s3081_s9, %s3081_s9, %s3080_s8  }
  0x69   : > { %s2732_s16 = scalar_lea.hbm %s3031_s0, %s2663_s24  ;;  %s338_s20 = scalar_lea.vmem [#allocation2], %s2667_s21 }
  0x6a   : > { %s345_s27 = sshll.u32 %s338_s20, 4  ;;  %s2739_s28 = scalar_lea.hbm %s3033_s2, %s2663_s24  ;;  %s346_s27 = int_to_ptr.vmem [resolvable:$true] %s345_s27 }
  0x6b   : > { %s3083_s25 = sand.u32 1, %s2503_s11   ;;  %s2345_s1 = scalar_lea.hbm %s2732_s16, 128 }
  0x6c   : > { %s335_s22 = scalar_lea.sflag [#allocation3], %s3083_s25  ;;  %p2346_p6 = scmp.ne.s32.totalorder %s2732_s16, %s2345_s1 }
  0x6d   : > { %s2350_s9 = scalar_lea.hbm %s3031_s0, 256  ;;  %p2351_p11 = scmp.lt.s32.totalorder %s2732_s16, %s3031_s0 }
  0x6e   : > { %p2348_p4 = pnand %p2346_p6, %p2687_p10  ;;  %p2352_p5 = scmp.lt.s32.totalorder %s2350_s9, %s2345_s1 }
  0x70   : > { %p2349_p8 = pneg %p2348_p4  ;;  %p2353_p2 = por %p2352_p5, %p2351_p11 }
  0x72   : > { %p2354_p13 = pnand %p2353_p2, %p2349_p8 }
  0x74   : > { %2357 = shalt.err (!%p2354_p13)
}
  0x75   : > { %s2358_s24 = scalar_lea.vmem %s346_s27, 128  ;;  %s2515_s20 = smov [#allocation2]  }
  0x76   : > { %p2359_p1 = scmp.ne.s32.totalorder %s346_s27, %s2358_s24  ;;  %s2363_s30 = sshll.u32 %s2515_s20, 4  ;;  %s2364_s30 = int_to_ptr.vmem [resolvable:$false] %s2363_s30 }
  0x77   : > { %s2365_s26 = scalar_lea.vmem %s2364_s30, 256  ;;  %p2366_p0 = scmp.lt.s32.totalorder %s346_s27, %s2364_s30 }
  0x78   : > { %p2361_p12 = pnand %p2359_p1, %p2687_p10  ;;  %p2367_p3 = scmp.lt.s32.totalorder %s2365_s26, %s2358_s24 }
  0x7a   : > { %p2362_p7 = pneg %p2361_p12  ;;  %p2368_p6 = por %p2367_p3, %p2366_p0 }
  0x7c   : > { %p2369_p4 = pnand %p2368_p6, %p2362_p7 }
  0x7e   : > { %2372 = shalt.err (!%p2369_p4)
}
  0x7f   : > { %2155 = dma.hbm_to_vmem [thread:$0]  (!%p2669_p9), %s2732_s16, 128, %s346_s27, %s335_s22  }
  0x80   : > { %s374_s1 = scalar_lea.vmem [#allocation7], %s2667_s21  ;;  %s2373_s23 = scalar_lea.hbm %s2739_s28, 128 }
  0x81   : > { %s381_s25 = sshll.u32 %s374_s1, 4  ;;  %p2374_p8 = scmp.ne.s32.totalorder %s2739_s28, %s2373_s23  ;;  %s382_s25 = int_to_ptr.vmem [resolvable:$true] %s381_s25 }
  0x82   : > { %s2378_s4 = scalar_lea.hbm %s3033_s2, 256  ;;  %p2379_p2 = scmp.lt.s32.totalorder %s2739_s28, %s3033_s2 }
  0x83   : > { %p2376_p11 = pnand %p2374_p8, %p2687_p10  ;;  %p2380_p13 = scmp.lt.s32.totalorder %s2378_s4, %s2373_s23 }
  0x85   : > { %p2377_p5 = pneg %p2376_p11  ;;  %p2381_p1 = por %p2380_p13, %p2379_p2 }
  0x87   : > { %p2382_p12 = pnand %p2381_p1, %p2377_p5 }
  0x89   : > { %2385 = shalt.err (!%p2382_p12)
}
  0x8a   : > { %s2386_s21 = scalar_lea.vmem %s382_s25, 128  ;;  %s2516_s16 = smov [#allocation7]  }
  0x8b   : > { %p2387_p7 = scmp.ne.s32.totalorder %s382_s25, %s2386_s21  ;;  %s2391_s27 = sshll.u32 %s2516_s16, 4  ;;  %s2392_s27 = int_to_ptr.vmem [resolvable:$false] %s2391_s27 }
  0x8c   : > { %s2393_s22 = scalar_lea.vmem %s2392_s27, 256  ;;  %p2394_p6 = scmp.lt.s32.totalorder %s382_s25, %s2392_s27 }
  0x8d   : > { %p2389_p0 = pnand %p2387_p7, %p2687_p10  ;;  %p2395_p4 = scmp.lt.s32.totalorder %s2393_s22, %s2386_s21 }
  0x8f   : > { %p2390_p3 = pneg %p2389_p0  ;;  %p2396_p8 = por %p2395_p4, %p2394_p6 }
  0x91   : > { %p2397_p11 = pnand %p2396_p8, %p2390_p3 }
  0x93   : > { %2400 = shalt.err (!%p2397_p11)
}
  0x94   : > { %2161 = dma.hbm_to_vmem [thread:$0]  (!%p2669_p9), %s2739_s28, 128, %s382_s25, %s2681_s18  }
  0x95   : > { %p3084_p5 = scmp.ne.s32.totalorder %s3069_s17, 0 }
  0x96   : > { %s2780_s29 = sand.u32 (!%p3084_p5), 1, %s2499_s10   ;;  %p3085_p10 = scmp.ne.s32.totalorder (!%p3084_p5), %s3066_s15, 0 }
  0x97   : > { %397 = sbr.rel (%p3084_p5) target bundleno = 3122 (0xc32), region = 52  ;;  %s2783_s20 = sshll.u32 (!%p3084_p5), %s2780_s29, 3 }
  0x98   : > { %s400_s30 = scalar_lea.sflag (!%p3084_p5), [#allocation3], %s2780_s29  ;;  %s403_s26 = scalar_lea.vmem (!%p3084_p5), [#allocation2], %s2783_s20 }
  0x9c   : > { %2470 = dma.done.wait (%p3085_p10), %s400_s30, 128  }
  0x9d   : > { %2472 = vsyncadd (%p3085_p10), %s400_s30, 4294967168  ;;  %s408_s17 = sand.u32 1, %s2597_s13   ;;  %s412_s19 = scalar_lea.vmem [#allocation5], %s2783_s20 }
  0x9e   : > { %s409_s18 = scalar_lea.sflag [#allocation6], %s408_s17 }
  0x9f   : > { %2474 = dma.done.wait (%p3085_p10), %s409_s18, 256  }
  0xa0   : > { %2476 = vsyncadd (%p3085_p10), %s409_s18, 4294967040  ;;  %s421_s28 = scalar_lea.vmem [#allocation7], %s2783_s20  ;;  %p3086_p9 = scmp.eq.s32.totalorder %s2597_s13, 0 }
  0xa2   : > { %2478 = dma.done.wait (%p3086_p9), [#allocation9], 1024   ;;  %p3087_p2 = pmov %p3086_p9 }
  0xa4   : > { %2480 = vsyncadd (%p3087_p2), [#allocation9], 4294966272  ;;  %p3088_p13 = pmov %p3087_p2 }
  0xa5   : > { %p3089_p1 = pmov %p3087_p2 }
  0xa6   : > { %2482 = dma.done.wait (%p3088_p13), [#allocation12], 512  }
  0xa7   : > { %2484 = vsyncadd (%p3089_p1), [#allocation12], 4294966784  ;;  %v2517_v0 = vmov 0.0   ;;  %vm2518_vm0 = vmmov 0   ;;  %v580_v1 = vld [vmem:[#allocation10 + $0x18] sm:$0xff]  ;;  %v579_v3 = vld [vmem:[#allocation10 + $0x10] sm:$0xff] }
  0xa8   : > { %2038 = vmatprep.subr.mxu1 %v2517_v0  ;;  %2027 = vmatprep.subr.mxu0 %v2517_v0  ;;  %v502_v2 = vld [vmem:[#allocation8 + $0x18] sm:$0xff]  ;;  %v501_v4 = vld [vmem:[#allocation8 + $0x10] sm:$0xff]  ;;  %v578_v5 = vld [vmem:[#allocation10 + $0x8] sm:$0xff]  ;;  %vm503_vm1 = vcmask 261120   ;;  %vm731_vm2 = vcmask 64512   ;;  %s2519_s15 = smov 120  }
  0xa9   : > { %2046 = vmatprep.mubr.msk.f32.mxu1 %vm2518_vm0, %v2517_v0  ;;  %2035 = vmatprep.mubr.msk.f32.mxu0 %vm2518_vm0, %v2517_v0  ;;  %v500_v6 = vld [vmem:[#allocation8 + $0x8] sm:$0xff]  ;;  %v577_v7 = vld [vmem:[#allocation10] sm:$0xff]  ;;  %v2820_v10 = vld [vmem:[%s403_s26] sm:$0xff]  ;;  %p487_p12 = scmp.lt.s32.totalorder %s2597_s13, 1  ;;  %s1956_s4 = sshll.u32 %s2780_s29, 5 }
  0xaa   : > { %2039 = vmatpush3.msra.mxu1 %v580_v1  ;;  %2028 = vmatpush3.msra.mxu0 %v502_v2  ;;  %v499_v8 = vld [vmem:[#allocation8] sm:$0xff]  ;;  %v657_v15 = vld [vmem:[#allocation11 + $0x18] sm:$0xff]  ;;  %v656_v16 = vld [vmem:[#allocation11 + $0x10] sm:$0xff]  ;;  %s2874_s12 = scalar_lea.vmem [#allocation14], %s1956_s4  ;;  %s2520_s16 = smov 112  }
  0xab   : > { %2040 = vmatprep.subr.mxu1 %v2517_v0  ;;  %2029 = vmatprep.subr.mxu0 %v2517_v0  ;;  %v492_v9 = vld [vmem:[%s412_s19] sm:$0xff]  ;;  %v493_v19 = vld [vmem:[%s421_s28] sm:$0xff]  ;;  %s488_s1 = scalar_select %p487_p12, %s2597_s13, 1 }
  0xac   : > { %2041 = vmatpush3.msra.mxu1 %v579_v3  ;;  %2030 = vmatpush3.msra.mxu0 %v501_v4  ;;  %v655_v17 = vld [vmem:[#allocation11 + $0x8] sm:$0xff]  ;;  %v654_v18 = vld [vmem:[#allocation11] sm:$0xff]  ;;  %v495_v38 = vld [vmem:[%s3038_s7] sm:$0xff]  ;;  %s2521_s27 = smov 104   ;;  %s1987_s28 = sshll.u32 %s2597_s13, 9 }
  0xad   : > { %2042 = vmatprep.subr.mxu1 %v2517_v0  ;;  %2031 = vmatprep.subr.mxu0 %v2517_v0  ;;  %s1957_s25 = sshll.u32 %s488_s1, 3  ;;  %v496_v54 = vld [vmem:[%s3038_s7 + $0x8] sm:$0xff]  ;;  %s3090_s23 = sld [smem:[#allocation30_spill]] }
  0xae   : > { %2043 = vmatpush3.msra.mxu1 %v578_v5  ;;  %2032 = vmatpush3.msra.mxu0 %v500_v6  ;;  %s490_s9 = scalar_lea.vmem %s3034_s3, %s1957_s25  ;;  %p3091_p0 = scmp.ne.s32.totalorder %s3074_s14, 0 }
  0xaf   : > { %2044 = vmatprep.subr.mxu1 %v2517_v0  ;;  %2033 = vmatprep.subr.mxu0 %v2517_v0  ;;  %v2862_v20 = vld [vmem:[%s490_s9] sm:$0xff]  ;;  %s1721_s9 = scalar_lea.sflag [#allocation15], %s2780_s29  ;;  %s2522_s24 = smov [#allocation14]  }
  0xb0   : > { %2045 = vmatpush3.msra.mxu1 %v577_v7  ;;  %2034 = vmatpush3.msra.mxu0 %v499_v8  ;;  %vm809_vm3 = vcmp.gt.f32.partialorder %v2862_v20, 0.0  ;;  %v498_v20 = vld [vmem:[%s3038_s7 + $0x18] sm:$0xff]  ;;  %s2405_s21 = sshll.u32 %s2522_s24, 4  ;;  %s2406_s21 = int_to_ptr.vmem [resolvable:$false] %s2405_s21 }
  0xb1   : > { %2047 = vmatmul.mubr.msk.f32.vlgmr.msra.gmra.mxu1 %vm503_vm1, %v492_v9  ;;  %2036 = vmatmul.mubr.msk.f32.vlgmr.msra.gmra.mxu0 %vm503_vm1, %v2820_v10 }
  0xb2   : > { %2060 = vmatprep.subr.mxu1 %v2517_v0  ;;  %2062 = vmatprep.mubr.msk.f32.mxu1 %vm2518_vm0, %v2517_v0 }
  0xb3   : > { %2049 = vmatprep.subr.mxu0 %v2517_v0  ;;  %2057 = vmatprep.mubr.msk.f32.mxu0 %vm2518_vm0, %v2517_v0  ;;  %s2967_s8 = scalar_lea.hbm %s3090_s23, %s1987_s28 }
  0xb4   : > { %2050 = vmatpush3.msra.mxu0 %v657_v15 }
  0xb5   : > { %2051 = vmatprep.subr.mxu0 %v2517_v0 }
  0xb6   : > { %2052 = vmatpush3.msra.mxu0 %v656_v16 }
  0xb7   : > { %2053 = vmatprep.subr.mxu0 %v2517_v0 }
  0xb8   : > { %2054 = vmatpush3.msra.mxu0 %v655_v17 }
  0xb9   : > { %2055 = vmatprep.subr.mxu0 %v2517_v0 }
  0xba   : > { %2056 = vmatpush3.msra.mxu0 %v654_v18 }
  0xbb   : > { %2058 = vmatmul.mubr.msk.f32.vlgmr.msra.gmra.mxu0 %vm503_vm1, %v493_v19  ;;  %2070 = vmatprep.subr.mxu0 %v2517_v0 }
  0xbc   : > { %2072 = vmatprep.mubr.msk.f32.mxu0 %vm2518_vm0, %v2517_v0  ;;  %2071 = vmatpush3.msra.mxu0 %v495_v38 }
  0xbd   : > { %2080 = vmatprep.subr.mxu0 %v2517_v0 }
 0x171   : > { %v2833_v11 = vpop.f32.mrf.mxu1  ;;  %v2835_v12 = vpop.f32.mrf.mxu0 }
 0x172   : > { %972 = vrot.lane.b32.xlu1 %v2833_v11, %s2519_s15  ;;  %2061 = vmatpush3.xpose.msk.msra.mxu1 %vm731_vm2, %v2833_v11 }
 0x173   : > { %v2048_v13 = vpop.f32.mrf.mxu1  ;;  %v2037_v14 = vpop.f32.mrf.mxu0  ;;  %2065 = vmatprep.subr.mxu1 %v2517_v0 }
 0x175   : > { %2063 = vmatmul.mubr.msk.f32.vlgmr.msra.gmra.mxu1 %vm731_vm2, %v2835_v12 }
 0x176   : > { %970 = vrot.lane.b32.xlu1 %v2835_v12, %s2519_s15  ;;  %2067 = vmatprep.mubr.msk.f32.mxu1 %vm2518_vm0, %v2517_v0 }
 0x17b   : > { %v2869_v31 = vpop.f32.mrf.mxu0 }
 0x17c   : > { %2066 = vmatpush3.msra.mxu1 %v2869_v31 }
 0x17d   : > { %v2059_v32 = vpop.f32.mrf.mxu0  ;;  %2075 = vmatprep.subr.mxu1 %v2517_v0 }
 0x1e4   : > { %v973_v35 = vpop.permute.xlu1 %972 }
 0x1e8   : > { %v971_v37 = vpop.permute.xlu1 %970 }
 0x235   : > { %v804_v21 = vpop.f32.mrf.mxu1 }
 0x236   : > { %v808_v22 = vmul.f32 0.35355338, %v804_v21 }
 0x237   : > { %v2064_v23 = vpop.f32.mrf.mxu1 }
 0x238   : > { %v810_v24 = vsel %vm809_vm3, -1e+09, %v808_v22 }
 0x239   : > { %v811_v25 = vsel %vm731_vm2, %v810_v24, -inf }
 0x23a   : > { %812 = vmax.xlane.f32.xlu0 %v811_v25 }
 0x2c3   : > { %v813_v26 = vpop.xlane.xlu0 %812 }
 0x2c4   : > { %v814_v27 = vsub.f32 %v810_v24, %v813_v26 }
 0x2c6   : > { %v815_v28 = vmul.f32 1.442695, %v814_v27 }
 0x2c8   : > { %2221 = vpow2.f32 %v815_v28 }
 0x2d5   : > { %v2222_v29 = vpop.eup %2221 }
 0x2d6   : > { %v817_v30 = vsel %vm731_vm2, %v2222_v29, 0.0 }
 0x2d7   : > { %818 = vadd.xlane.f32.xlu0 %v817_v30 }
 0x360   : > { %v819_v33 = vpop.xlane.xlu0 %818 }
 0x361   : > { %2223 = vrcp.f32 %v819_v33 }
 0x36e   : > { %v2224_v34 = vpop.eup %2223 }
 0x36f   : > { %v821_v36 = vmul.f32 %v2224_v34, %v2222_v29 }
 0x371   : > { %822 = vst.msk [vmem:[%s2874_s12] sm:$0xff] %vm731_vm2, %v821_v36  ;;  %2068 = vmatmul.mubr.msk.f32.vlgmr.msra.gmra.mxu1 %vm731_vm2, %v821_v36 }
 0x372   : > { %2076 = vmatpush3.xpose.msk.msra.mxu1 %vm731_vm2, %v973_v35  ;;  %2077 = vmatprep.mubr.msk.f32.mxu1 %vm2518_vm0, %v2517_v0 }
 0x373   : > { %2085 = vmatprep.subr.mxu1 %v2517_v0 }
 0x375   : > { %2078 = vmatmul.mubr.msk.f32.vlgmr.msra.gmra.mxu1 %vm731_vm2, %v971_v37 }
 0x376   : > { %2087 = vmatprep.mubr.msk.f32.mxu1 %vm2518_vm0, %v2517_v0  ;;  %2086 = vmatpush3.msra.mxu1 %v496_v54 }
 0x377   : > { %2095 = vmatprep.subr.mxu1 %v2517_v0 }
 0x431   : > { %v892_v39 = vpop.f32.mrf.mxu1 }
 0x432   : > { %2073 = vmatmul.mubr.msk.f32.vlgmr.msra.gmra.mxu0 %vm731_vm2, %v892_v39 }
 0x433   : > { %v2069_v40 = vpop.f32.mrf.mxu1  ;;  %2082 = vmatprep.mubr.msk.f32.mxu0 %vm2518_vm0, %v2517_v0 }
 0x435   : > { %v1044_v41 = vpop.f32.mrf.mxu1 }
 0x436   : > { %v1048_v42 = vmul.f32 0.35355338, %v1044_v41 }
 0x437   : > { %v2079_v43 = vpop.f32.mrf.mxu1 }
 0x438   : > { %v1049_v44 = vsel %vm809_vm3, -1e+09, %v1048_v42 }
 0x439   : > { %v1050_v45 = vsel %vm731_vm2, %v1049_v44, -inf }
 0x43a   : > { %1051 = vmax.xlane.f32.xlu0 %v1050_v45 }
 0x450   : > { %1064 = vrot.lane.b32.xlu0 %v2869_v31, %s2519_s15  ;;  %s1747_s15 = sshll.u32 %s2874_s12, 4  ;;  %s2969_s15 = int_to_ptr.vmem [resolvable:$true] %s1747_s15 }
 0x451   : > { %s2401_s4 = scalar_lea.vmem %s2969_s15, 512  ;;  %p2408_p4 = scmp.lt.s32.totalorder %s2969_s15, %s2406_s21 }
 0x452   : > { %p2402_p7 = scmp.ne.s32.totalorder %s2969_s15, %s2401_s4 }
 0x454   : > { %1216 = vrot.lane.b32.xlu0 %v2833_v11, %s2520_s16  ;;  %p2403_p3 = pnand %p2402_p7, %p3091_p0 }
 0x456   : > { %p2404_p6 = pneg %p2403_p3 }
 0x458   : > { %1214 = vrot.lane.b32.xlu0 %v2835_v12, %s2520_s16 }
 0x4c3   : > { %v1052_v46 = vpop.xlane.xlu0 %1051 }
 0x4c4   : > { %v1053_v47 = vsub.f32 %v1049_v44, %v1052_v46 }
 0x4c6   : > { %v1054_v48 = vmul.f32 1.442695, %v1053_v47 }
 0x4c7   : > { %v1065_v49 = vpop.permute.xlu0 %1064 }
 0x4c8   : > { %2225 = vpow2.f32 %v1054_v48  ;;  %2081 = vmatpush3.msra.mxu0 %v1065_v49 }
 0x4c9   : > { %2090 = vmatprep.subr.mxu0 %v2517_v0 }
 0x4cb   : > { %v1217_v57 = vpop.permute.xlu0 %1216 }
 0x4cf   : > { %v1215_v59 = vpop.permute.xlu0 %1214 }
 0x4d5   : > { %v2226_v50 = vpop.eup %2225 }
 0x4d6   : > { %v1056_v51 = vsel %vm731_vm2, %v2226_v50, 0.0 }
 0x4d7   : > { %1057 = vadd.xlane.f32.xlu1 %v1056_v51 }
 0x4e8   : > { %1307 = vrot.lane.b32.xlu1 %v2869_v31, %s2520_s16 }
 0x4ec   : > { %1459 = vrot.lane.b32.xlu1 %v2833_v11, %s2521_s27 }
 0x4f2   : > { %v965_v52 = vpop.f32.mrf.mxu0 }
 0x4f3   : > { %v969_v11 = vadd.f32 %v965_v52, %v2820_v10 }
 0x4f4   : > { %v2074_v53 = vpop.f32.mrf.mxu0 }
 0x560   : > { %v1058_v55 = vpop.xlane.xlu1 %1057 }
 0x561   : > { %2227 = vrcp.f32 %v1058_v55 }
 0x564   : > { %v1308_v61 = vpop.permute.xlu1 %1307 }
 0x568   : > { %v1460_v16 = vpop.permute.xlu1 %1459 }
 0x56e   : > { %v2228_v56 = vpop.eup %2227 }
 0x56f   : > { %v1060_v58 = vmul.f32 %v2228_v56, %v2226_v50 }
 0x571   : > { %1967 = vst.msk [vmem:[%s2874_s12 + $0x8] sm:$0xff] %vm731_vm2, %v1060_v58  ;;  %2083 = vmatmul.mubr.msk.f32.vlgmr.msra.gmra.mxu0 %vm731_vm2, %v1060_v58 }
 0x572   : > { %2091 = vmatpush3.xpose.msk.msra.mxu0 %vm731_vm2, %v1217_v57  ;;  %2092 = vmatprep.mubr.msk.f32.mxu0 %vm2518_vm0, %v2517_v0 }
 0x573   : > { %2100 = vmatprep.subr.mxu0 %v2517_v0 }
 0x575   : > { %2093 = vmatmul.mubr.msk.f32.vlgmr.msra.gmra.mxu0 %vm731_vm2, %v1215_v59 }
 0x576   : > { %2102 = vmatprep.mubr.msk.f32.mxu0 %vm2518_vm0, %v2517_v0 }
 0x631   : > { %v1136_v60 = vpop.f32.mrf.mxu0 }
 0x632   : > { %2088 = vmatmul.mubr.msk.f32.vlgmr.msra.gmra.mxu1 %vm731_vm2, %v1136_v60 }
 0x633   : > { %2096 = vmatpush3.msra.mxu1 %v1308_v61  ;;  %v2084_v62 = vpop.f32.mrf.mxu0  ;;  %2097 = vmatprep.mubr.msk.f32.mxu1 %vm2518_vm0, %v2517_v0 }
 0x634   : > { %2105 = vmatprep.subr.mxu1 %v2517_v0 }
 0x635   : > { %v1288_v63 = vpop.f32.mrf.mxu0 }
 0x636   : > { %v1292_v1 = vmul.f32 0.35355338, %v1288_v63 }
 0x637   : > { %v2094_v2 = vpop.f32.mrf.mxu0 }
 0x638   : > { %v1293_v3 = vsel %vm809_vm3, -1e+09, %v1292_v1 }
 0x639   : > { %v1294_v4 = vsel %vm731_vm2, %v1293_v3, -inf }
 0x63a   : > { %1295 = vmax.xlane.f32.xlu0 %v1294_v4 }
 0x6c3   : > { %v1296_v5 = vpop.xlane.xlu0 %1295 }
 0x6c4   : > { %v1297_v6 = vsub.f32 %v1293_v3, %v1296_v5 }
 0x6c6   : > { %v1298_v7 = vmul.f32 1.442695, %v1297_v6 }
 0x6c8   : > { %2229 = vpow2.f32 %v1298_v7 }
 0x6d5   : > { %v2230_v8 = vpop.eup %2229 }
 0x6d6   : > { %v1300_v9 = vsel %vm731_vm2, %v2230_v8, 0.0 }
 0x6d7   : > { %1301 = vadd.xlane.f32.xlu1 %v1300_v9 }
 0x6e8   : > { %1457 = vrot.lane.b32.xlu1 %v2835_v12, %s2521_s27  ;;  %v497_v12 = vld [vmem:[%s3038_s7 + $0x10] sm:$0xff] }
 0x6e9   : > { %2101 = vmatpush3.msra.mxu0 %v497_v12 }
 0x6ea   : > { %2110 = vmatprep.subr.mxu0 %v2517_v0 }
 0x6f2   : > { %v1209_v13 = vpop.f32.mrf.mxu1 }
 0x6f3   : > { %v1213_v14 = vadd.f32 %v1209_v13, %v969_v11 }
 0x6f4   : > { %v2089_v15 = vpop.f32.mrf.mxu1 }
 0x760   : > { %v1302_v17 = vpop.xlane.xlu1 %1301 }
 0x761   : > { %2231 = vrcp.f32 %v1302_v17 }
 0x764   : > { %v1458_v10 = vpop.permute.xlu1 %1457 }
 0x76e   : > { %v2232_v18 = vpop.eup %2231 }
 0x76f   : > { %v1304_v19 = vmul.f32 %v2232_v18, %v2230_v8 }
 0x771   : > { %1972 = vst.msk [vmem:[%s2874_s12 + $0x10] sm:$0xff] %vm731_vm2, %v1304_v19  ;;  %2098 = vmatmul.mubr.msk.f32.vlgmr.msra.gmra.mxu1 %vm731_vm2, %v1304_v19 }
 0x772   : > { %2106 = vmatpush3.xpose.msk.msra.mxu1 %vm731_vm2, %v1460_v16  ;;  %2107 = vmatprep.mubr.msk.f32.mxu1 %vm2518_vm0, %v2517_v0 }
 0x773   : > { %2115 = vmatprep.subr.mxu1 %v2517_v0 }
 0x775   : > { %2108 = vmatmul.mubr.msk.f32.vlgmr.msra.gmra.mxu1 %vm731_vm2, %v1458_v10 }
 0x776   : > { %2117 = vmatprep.mubr.msk.f32.mxu1 %vm2518_vm0, %v2517_v0  ;;  %2116 = vmatpush3.msra.mxu1 %v498_v20 }
 0x831   : > { %v1379_v21 = vpop.f32.mrf.mxu1 }
 0x832   : > { %2103 = vmatmul.mubr.msk.f32.vlgmr.msra.gmra.mxu0 %vm731_vm2, %v1379_v21 }
 0x833   : > { %v2099_v22 = vpop.f32.mrf.mxu1  ;;  %2112 = vmatprep.mubr.msk.f32.mxu0 %vm2518_vm0, %v2517_v0 }
 0x835   : > { %v1531_v23 = vpop.f32.mrf.mxu1 }
 0x836   : > { %v1535_v24 = vmul.f32 0.35355338, %v1531_v23 }
 0x837   : > { %v2109_v25 = vpop.f32.mrf.mxu1 }
 0x838   : > { %v1536_v26 = vsel %vm809_vm3, -1e+09, %v1535_v24 }
 0x839   : > { %v1537_v27 = vsel %vm731_vm2, %v1536_v26, -inf }
 0x83a   : > { %1538 = vmax.xlane.f32.xlu0 %v1537_v27 }
 0x850   : > { %1550 = vrot.lane.b32.xlu0 %v2869_v31, %s2521_s27 }
 0x8c3   : > { %v1539_v28 = vpop.xlane.xlu0 %1538 }
 0x8c4   : > { %v1540_v29 = vsub.f32 %v1536_v26, %v1539_v28 }
 0x8c6   : > { %v1541_v30 = vmul.f32 1.442695, %v1540_v29 }
 0x8c7   : > { %v1551_v32 = vpop.permute.xlu0 %1550 }
 0x8c8   : > { %2233 = vpow2.f32 %v1541_v30  ;;  %2111 = vmatpush3.msra.mxu0 %v1551_v32 }
 0x8d5   : > { %v2234_v0 = vpop.eup %2233 }
 0x8d6   : > { %v1543_v33 = vsel %vm731_vm2, %v2234_v0, 0.0 }
 0x8d7   : > { %1544 = vadd.xlane.f32.xlu1 %v1543_v33 }
 0x8f2   : > { %v1452_v34 = vpop.f32.mrf.mxu0 }
 0x8f3   : > { %v1456_v35 = vadd.f32 %v1452_v34, %v1213_v14 }
 0x8f4   : > { %v2104_v36 = vpop.f32.mrf.mxu0 }
 0x960   : > { %v1545_v31 = vpop.xlane.xlu1 %1544 }
 0x961   : > { %2235 = vrcp.f32 %v1545_v31 }
 0x96e   : > { %v2236_v37 = vpop.eup %2235 }
 0x96f   : > { %v1547_v38 = vmul.f32 %v2236_v37, %v2234_v0 }
 0x971   : > { %1977 = vst.msk [vmem:[%s2874_s12 + $0x18] sm:$0xff] %vm731_vm2, %v1547_v38  ;;  %2113 = vmatmul.mubr.msk.f32.vlgmr.msra.gmra.mxu0 %vm731_vm2, %v1547_v38  ;;  %s2407_s12 = scalar_lea.vmem %s2406_s21, 1024 }
 0x972   : > { %p2409_p8 = scmp.lt.s32.totalorder %s2407_s12, %s2401_s4 }
 0x974   : > { %p2410_p11 = por %p2409_p8, %p2408_p4 }
 0x976   : > { %p2411_p5 = pnand %p2410_p11, %p2404_p6 }
 0xa31   : > { %v1622_v39 = vpop.f32.mrf.mxu0 }
 0xa32   : > { %2118 = vmatmul.mubr.msk.f32.vlgmr.msra.gmra.mxu1 %vm731_vm2, %v1622_v39 }
 0xa33   : > { %v2114_v40 = vpop.f32.mrf.mxu0 }
 0xaf2   : > { %v1695_v41 = vpop.f32.mrf.mxu1 }
 0xaf3   : > { %v1699_v42 = vadd.f32 %v1695_v41, %v1456_v35 }
 0xaf4   : > { %v2119_v43 = vpop.f32.mrf.mxu1 }
 0xaf5   : > { %v1700_v44 = vsel %vm503_vm1, %v1699_v42, 0.0 }
 0xaf6   : > { %1701 = vadd.xlane.f32.xlu0 %v1700_v44 }
 0xb7f   : > { %v1702_v45 = vpop.xlane.xlu0 %1701 }
 0xb80   : > { %v1704_v46 = vmul.f32 0.03125, %v1702_v45 }
 0xb82   : > { %v1705_v47 = vsub.f32 %v1699_v42, %v1704_v46 }
 0xb84   : > { %v1706_v48 = vmul.f32 %v1705_v47, %v1705_v47 }
 0xb86   : > { %v1707_v49 = vsel %vm503_vm1, %v1706_v48, 0.0 }
 0xb87   : > { %1708 = vadd.xlane.f32.xlu1 %v1707_v49 }
 0xb88   : > { %2414 = shalt.err (!%p2411_p5)
}
 0xb89   : > { %s2415_s16 = scalar_lea.hbm %s2967_s8, 512  ;;  %s2419_s30 = scalar_lea.hbm %s3090_s23, 1024 }
 0xb8a   : > { %p2416_p10 = scmp.ne.s32.totalorder %s2967_s8, %s2415_s16  ;;  %p2420_p13 = scmp.lt.s32.totalorder %s2967_s8, %s3090_s23 }
 0xb8b   : > { %p2421_p1 = scmp.lt.s32.totalorder %s2419_s30, %s2415_s16 }
 0xb8c   : > { %p2417_p9 = pnand %p2416_p10, %p3091_p0 }
 0xb8d   : > { %p2422_p12 = por %p2421_p1, %p2420_p13 }
 0xb8e   : > { %p2418_p2 = pneg %p2417_p9 }
 0xb90   : > { %p2423_p7 = pnand %p2422_p12, %p2418_p2 }
 0xb92   : > { %2426 = shalt.err (!%p2423_p7)
}
 0xb93   : > { %s2523_s18 = smov 128   ;;  %s2524_s19 = smov 8  }
 0xb94   : > { %2139 = dma.vmem_to_hbm [thread:$0]  (%p3091_p0), %s2969_s15, 512, %s2967_s8, %s1721_s9, %s2523_s18, %s2523_s18, %s2524_s19  }
 0xb95   : > { %s1982_s28 = sshll.u32 %s2597_s13, 7  ;;  %s479_s1 = scalar_lea.vmem [#allocation13], %s2783_s20 }
 0xb96   : > { %s1734_s25 = sshll.u32 %s479_s1, 4  ;;  %s3092_s21 = sld [smem:[#allocation29_spill]]  ;;  %s1735_s25 = int_to_ptr.vmem [resolvable:$true] %s1734_s25 }
 0xb97   : > { %s1716_s16 = scalar_lea.sflag [#allocation4], %s2780_s29  ;;  %s2427_s27 = scalar_lea.vmem %s1735_s25, 128 }
 0xb98   : > { %p2428_p3 = scmp.ne.s32.totalorder %s1735_s25, %s2427_s27  ;;  %s2525_s15 = smov [#allocation13]  }
 0xb99   : > { %s2431_s8 = sshll.u32 %s2525_s15, 4  ;;  %s2432_s8 = int_to_ptr.vmem [resolvable:$false] %s2431_s8 }
 0xb9a   : > { %p2429_p6 = pnand %p2428_p3, %p3091_p0  ;;  %s2433_s13 = scalar_lea.vmem %s2432_s8, 256 }
 0xb9b   : > { %p2434_p8 = scmp.lt.s32.totalorder %s1735_s25, %s2432_s8  ;;  %p2435_p11 = scmp.lt.s32.totalorder %s2433_s13, %s2427_s27 }
 0xb9c   : > { %s1732_s12 = scalar_lea.hbm %s3092_s21, %s1982_s28  ;;  %p2430_p4 = pneg %p2429_p6 }
 0xb9d   : > { %p2436_p5 = por %p2435_p11, %p2434_p8 }
 0xb9f   : > { %p2437_p10 = pnand %p2436_p5, %p2430_p4 }
 0xc10   : > { %v1709_v50 = vpop.xlane.xlu1 %1708 }
 0xc11   : > { %v1710_v51 = vmul.f32 0.03125, %v1709_v50 }
 0xc13   : > { %v1711_v52 = vadd.f32 1e-05, %v1710_v51 }
 0xc15   : > { %2237 = vrsqrt.f32 %v1711_v52 }
 0xc22   : > { %v2238_v53 = vpop.eup %2237 }
 0xc23   : > { %v1713_v54 = vmul.f32 %v2238_v53, %v1705_v47 }
 0xc25   : > { %1714 = vst.msk [vmem:[%s479_s1] sm:$0xff] %vm503_vm1, %v1713_v54 }
 0xc26   : > { %2440 = shalt.err (!%p2437_p10)
}
 0xc27   : > { %s2441_s20 = scalar_lea.hbm %s1732_s12, 128  ;;  %s2445_s22 = scalar_lea.hbm %s3092_s21, 256 }
 0xc28   : > { %p2442_p9 = scmp.ne.s32.totalorder %s1732_s12, %s2441_s20  ;;  %p2446_p1 = scmp.lt.s32.totalorder %s1732_s12, %s3092_s21 }
 0xc29   : > { %p2447_p12 = scmp.lt.s32.totalorder %s2445_s22, %s2441_s20 }
 0xc2a   : > { %p2443_p2 = pnand %p2442_p9, %p3091_p0 }
 0xc2b   : > { %p2448_p7 = por %p2447_p12, %p2446_p1 }
 0xc2c   : > { %p2444_p13 = pneg %p2443_p2 }
 0xc2e   : > { %p2449_p3 = pnand %p2448_p7, %p2444_p13 }
 0xc30   : > { %2452 = shalt.err (!%p2449_p3)
}
 0xc31   : > { %2138 = dma.vmem_to_hbm [thread:$0]  (%p3091_p0), %s1735_s25, 128, %s1732_s12, %s1716_s16  }
 0xc32 PF: > { %s3093_s17 = sld [smem:[#allocation22_spill]] }
 0xc33   : > { %s3094_s18 = sld [smem:[#allocation24_spill]] }
 0xc34   : > { %s3095_s19 = sld [smem:[#allocation23_spill]] }
 0xc38   : > { %s1762_s28 = sand.u32 1, %s3093_s17  }
 0xc39   : > { %p3096_p6 = scmp.ne.s32.totalorder %s3094_s18, 0  ;;  %s1763_s1 = scalar_lea.sflag [#allocation4], %s1762_s28 }
 0xc3a   : > { %p3097_p4 = scmp.ge.s32.totalorder %s3095_s19, 2 }
 0xc3c   : > { %p2163_p8 = pnand %p3097_p4, %p3096_p6 }
 0xc3e   : > { %p2164_p11 = pneg %p2163_p8 }
 0xc40   : > { %2486 = dma.done.wait (%p2164_p11), %s1763_s1, 128  }
 0xc41   : > { %2488 = vsyncadd (%p2164_p11), %s1763_s1, 4294967168  ;;  %s1772_s4 = scalar_lea.sflag [#allocation15], %s1762_s28 }
 0xc42   : > { %2490 = dma.done.wait (%p2164_p11), %s1772_s4, 512  }
 0xc43   : > { %2492 = vsyncadd (%p2164_p11), %s1772_s4, 4294966784  ;;  %s3098_s12 = sld [smem:[#allocation25_spill]]  ;;  %s3100_s30 = smov %s2499_s10 }
 0xc44   : > { %s3099_s14 = sld [smem:[#allocation26_spill]]  ;;  %s3101_s10 = smov %s2503_s11 }
 0xc49   : > { %p31_p0 = scmp.ge.s32.totalorder %s3098_s12, 4  }
 0xc4a   : > { %s3102_s11 = smov %s3099_s14 }
 0xc4b   :  { %33 = sbr.rel (!%p31_p0) target bundleno = 16 (0x10), region = 156 }
 0xc50   :  { %1777 = vsyncpa [#allocation3], 1 }
 0xc51   :  { %1779 = vsyncpa [#allocation3 + $0x1], 1 }
 0xc52   :  { %1780 = vsyncpa [#allocation6], 1 }
 0xc53   :  { %1782 = vsyncpa [#allocation6 + $0x1], 1 }
 0xc54   :  { %1783 = vsyncpa [#allocation9], 1 }
 0xc55   :  { %1784 = vsyncpa [#allocation12], 1 }
 0xc56   :  { %1785 = vsyncpa [#allocation4], 1 }
 0xc57   :  { %1787 = vsyncpa [#allocation4 + $0x1], 1 }
 0xc58   :  { %1788 = vsyncpa [#allocation15], 1 }
 0xc59   :  { %1790 = vsyncpa [#allocation15 + $0x1], 1 }

</bundles_post_ra>
